<compile_context>
chip_gen: v7x
topology: tpu7x:2x2x1
jax: 0.10.0
libtpu: 0.0.40
codegen_flags: <defaults>
</compile_context>

<pallas_src>
import functools

import jax
import jax.numpy as jnp
from jax import lax
from jax.experimental import pallas as pl
from jax.experimental.pallas import tpu as pltpu


# ---------------------------------------------------------------------------
# Fused kernel: for one batch element
#   qkv = x @ Wqkv                      (one wide MXU matmul, all heads at once)
#   per head: causal softmax(q k^T * C^-0.5) @ v
#   y = concat(heads) @ Wproj + b       (fused epilogue, lane-dense store)
# ---------------------------------------------------------------------------
def _mha_fused_kernel(x_ref, wqkv_ref, wproj_ref, bproj_ref, o_ref, *,
                      num_heads, head_size, scale):
    x = x_ref[0]                                   # (T, C)
    T = x.shape[0]
    E = num_heads * head_size

    # One wide matmul for all heads' Q, K, V (N = 3*E output columns).
    # If x / weights were bf16 the MXU bf16 path would be used automatically while
    # accumulation stays f32 via preferred_element_type.
    qkv = jnp.dot(x, wqkv_ref[...], preferred_element_type=jnp.float32)  # (T, 3E)
    # Lane-aligned slices (offsets are multiples of E).
    q = qkv[:, :E] * scale                         # fold C^-0.5 into q (T*E, not T*T)
    k = qkv[:, E:2 * E]
    v = qkv[:, 2 * E:]

    # Causal mask computed once, reused by every head.
    row = lax.broadcasted_iota(jnp.int32, (T, T), 0)
    col = lax.broadcasted_iota(jnp.int32, (T, T), 1)
    causal = col <= row                            # every row keeps >=1 entry (diag)

    head_outs = []
    for h in range(num_heads):                     # static unroll; num_heads is small
        lo = h * head_size
        hi = lo + head_size
        qh = q[:, lo:hi]                           # (T, hs)
        kh = k[:, lo:hi]
        vh = v[:, lo:hi]

        # q @ k^T expressed as a contraction on dim 1 of both operands.
        s = lax.dot_general(qh, kh, (((1,), (1,)), ((), ())),
                            preferred_element_type=jnp.float32)          # (T, T)
        s = jnp.where(causal, s, -jnp.inf)

        m = jnp.max(s, axis=-1, keepdims=True)
        p = jnp.exp(s - m)                         # masked entries -> exp(-inf) = 0
        l = jnp.sum(p, axis=-1, keepdims=True)

        # Normalize AFTER the PV matmul: the multiply touches (T, hs), not (T, T).
        oh = jnp.dot(p, vh, preferred_element_type=jnp.float32)          # (T, hs)
        head_outs.append(oh * pl.reciprocal(l, approx=False))

    attn = jnp.concatenate(head_outs, axis=-1)                           # (T, E)

    # Fused output projection epilogue (single K=E MXU matmul) + bias.
    y = jnp.dot(attn, wproj_ref[...], preferred_element_type=jnp.float32)
    y = y + bproj_ref[...]                                               # (T, C)+(1, C)
    # TODO(synk): dropout(y) skipped (eval mode).
    o_ref[0] = y.astype(o_ref.dtype)


def multi_head_attention(x, wq, wk, wv, w_proj, b_proj):
    """x: (B, T, C); wq/wk/wv: (H, C, hs); w_proj: (H*hs, C); b_proj: (C,)."""
    B, T, C = x.shape
    H, _, hs = wq.shape
    E = H * hs
    scale = float(C) ** -0.5                       # nanoGPT Head scales by n_embd

    # Stack per-head weights lane-dense: columns ordered [head0 | head1 | ...] inside
    # each of the Q/K/V blocks, so in-kernel slices q[:, h*hs:(h+1)*hs] hit head h.
    wq_all = jnp.transpose(wq, (1, 0, 2)).reshape(C, E)
    wk_all = jnp.transpose(wk, (1, 0, 2)).reshape(C, E)
    wv_all = jnp.transpose(wv, (1, 0, 2)).reshape(C, E)
    wqkv = jnp.concatenate([wq_all, wk_all, wv_all], axis=1)             # (C, 3E)

    itemsize = jnp.dtype(x.dtype).itemsize
    flops = B * (2 * T * C * 3 * E            # QKV projection
                 + H * (2 * T * T * hs) * 2   # scores + PV per head
                 + 2 * T * E * C)             # output projection
    bytes_accessed = itemsize * (x.size + wqkv.size + w_proj.size
                                 + b_proj.size + B * T * C)
    cost = pl.CostEstimate(flops=flops,
                           transcendentals=B * H * T * T,
                           bytes_accessed=bytes_accessed)

    kernel = functools.partial(_mha_fused_kernel,
                               num_heads=H, head_size=hs, scale=scale)

    return pl.pallas_call(
        kernel,
        out_shape=jax.ShapeDtypeStruct((B, T, C), x.dtype),
        grid=(B,),
        in_specs=[
            pl.BlockSpec((1, T, C), lambda b: (b, 0, 0)),    # x[b]
            pl.BlockSpec((C, 3 * E), lambda b: (0, 0)),      # stacked QKV weights
            pl.BlockSpec((E, C), lambda b: (0, 0)),          # W_proj
            pl.BlockSpec((1, C), lambda b: (0, 0)),          # b_proj
        ],
        out_specs=pl.BlockSpec((1, T, C), lambda b: (b, 0, 0)),
        compiler_params=pltpu.CompilerParams(
            dimension_semantics=("parallel",),
            # Full-scores footprint at block_size<=256, n_embd=384 is only a few
            # MiB; 32 MiB scoped limit is safe on v5e/v6e/v7x alike.
            vmem_limit_bytes=32 * 1024 * 1024,
        ),
        cost_estimate=cost,
    )(x, wqkv, w_proj, b_proj.reshape(1, C))


# ---------------------------------------------------------------------------
# Pure-JAX reference (mirrors the PyTorch forward, eval mode).
# ---------------------------------------------------------------------------
def _reference(x, wq, wk, wv, w_proj, b_proj):
    B, T, C = x.shape
    scale = float(C) ** -0.5
    q = jnp.einsum("btc,hcd->bhtd", x, wq)
    k = jnp.einsum("btc,hcd->bhtd", x, wk)
    v = jnp.einsum("btc,hcd->bhtd", x, wv)
    wei = jnp.einsum("bhtd,bhsd->bhts", q, k) * scale
    mask = jnp.tril(jnp.ones((T, T), dtype=bool))
    wei = jnp.where(mask, wei, -jnp.inf)
    wei = jax.nn.softmax(wei, axis=-1)
    out = jnp.einsum("bhts,bhsd->bhtd", wei, v)
    out = jnp.transpose(out, (0, 2, 1, 3)).reshape(B, T, -1)
    return out @ w_proj + b_proj


if __name__ == "__main__":
    # Small, module-consistent shapes: n_embd = num_heads * head_size
    B, T = 2, 8
    num_heads, head_size = 4, 8
    n_embd = num_heads * head_size        # 32

    key = jax.random.PRNGKey(0)
    kx, kq, kk, kv, kp, kb = jax.random.split(key, 6)

    x = jax.random.normal(kx, (B, T, n_embd), dtype=jnp.float32)
    wq = jax.random.normal(kq, (num_heads, n_embd, head_size), jnp.float32) * 0.02
    wk = jax.random.normal(kk, (num_heads, n_embd, head_size), jnp.float32) * 0.02
    wv = jax.random.normal(kv, (num_heads, n_embd, head_size), jnp.float32) * 0.02
    w_proj = jax.random.normal(kp, (n_embd, n_embd), jnp.float32) * 0.02
    b_proj = jax.random.normal(kb, (n_embd,), jnp.float32) * 0.02

    out = multi_head_attention(x, wq, wk, wv, w_proj, b_proj)
    out = jax.block_until_ready(out)

    ref = _reference(x, wq, wk, wv, w_proj, b_proj)
    assert out.shape == (B, T, n_embd)
    assert jnp.allclose(out, ref, atol=1e-4, rtol=1e-4), "mismatch vs reference"

    print("KERNEL_OK")
</pallas_src>

<mosaic_0001>
module attributes {stable_mosaic.version = 11 : i64} {
  func.func @_mha_fused_kernel(%arg0: i32, %arg1: memref<1x8x32xf32, #tpu.memory_space<vmem>>, %arg2: memref<32x96xf32, #tpu.memory_space<vmem>>, %arg3: memref<32x32xf32, #tpu.memory_space<vmem>>, %arg4: memref<1x32xf32, #tpu.memory_space<vmem>>, %arg5: memref<1x8x32xf32, #tpu.memory_space<vmem>>) attributes {dimension_semantics = [#tpu.dimension_semantics<parallel>], iteration_bounds = array<i64: 2>, scalar_prefetch = 0 : i64, scratch_operands = 0 : i64, tpu.core_type = #tpu.core_type<tc>, window_params = [{transform_indices = @transform_0, window_bounds = array<i64: 1, 8, 32>}, {pipeline_mode = #tpu.pipeline_mode<synchronous>, transform_indices = @transform_1, window_bounds = array<i64: 32, 96>}, {pipeline_mode = #tpu.pipeline_mode<synchronous>, transform_indices = @transform_2, window_bounds = array<i64: 32, 32>}, {pipeline_mode = #tpu.pipeline_mode<synchronous>, transform_indices = @transform_3, window_bounds = array<i64: 1, 32>}, {transform_indices = @transform_4, window_bounds = array<i64: 1, 8, 32>}]} {
    %c0 = arith.constant 0 : index
    %c0_0 = arith.constant 0 : index
    %c0_1 = arith.constant 0 : index
    %0 = vector.load %arg1[%c0, %c0_0, %c0_1] : memref<1x8x32xf32, #tpu.memory_space<vmem>>, vector<1x8x32xf32>
    %1 = vector.shape_cast %0 : vector<1x8x32xf32> to vector<8x32xf32>
    %c0_2 = arith.constant 0 : index
    %c0_3 = arith.constant 0 : index
    %2 = vector.load %arg2[%c0_2, %c0_3] : memref<32x96xf32, #tpu.memory_space<vmem>>, vector<32x96xf32>
    %cst = arith.constant dense<0.000000e+00> : vector<8x96xf32>
    %3 = tpu.matmul %1, %2, %cst {dimension_numbers = #tpu.dot_dimension_numbers<[1], [0], [0], [1], [0, 0, 1, 1], [], []>} : vector<8x32xf32>, vector<32x96xf32>, vector<8x96xf32> -> vector<8x96xf32>
    %4 = vector.extract_strided_slice %3 {offsets = [0, 0], sizes = [8, 32], strides = [1, 1]} : vector<8x96xf32> to vector<8x32xf32>
    %cst_4 = arith.constant 0.176776692 : f32
    %5 = vector.broadcast %cst_4 : f32 to vector<8x32xf32>
    %6 = arith.mulf %4, %5 : vector<8x32xf32>
    %7 = vector.extract_strided_slice %3 {offsets = [0, 32], sizes = [8, 32], strides = [1, 1]} : vector<8x96xf32> to vector<8x32xf32>
    %8 = vector.extract_strided_slice %3 {offsets = [0, 64], sizes = [8, 32], strides = [1, 1]} : vector<8x96xf32> to vector<8x32xf32>
    %9 = tpu.iota {dimensions = array<i32: 0>} : vector<8x8xi32>
    %10 = tpu.iota {dimensions = array<i32: 1>} : vector<8x8xi32>
    %11 = arith.cmpi sle, %10, %9 : vector<8x8xi32>
    %12 = vector.extract_strided_slice %6 {offsets = [0, 0], sizes = [8, 8], strides = [1, 1]} : vector<8x32xf32> to vector<8x8xf32>
    %13 = vector.extract_strided_slice %7 {offsets = [0, 0], sizes = [8, 8], strides = [1, 1]} : vector<8x32xf32> to vector<8x8xf32>
    %14 = vector.extract_strided_slice %8 {offsets = [0, 0], sizes = [8, 8], strides = [1, 1]} : vector<8x32xf32> to vector<8x8xf32>
    %cst_5 = arith.constant dense<0.000000e+00> : vector<8x8xf32>
    %15 = tpu.matmul %12, %13, %cst_5 {dimension_numbers = #tpu.dot_dimension_numbers<[1], [1], [0], [0], [0, 0, 1, 0], [], []>} : vector<8x8xf32>, vector<8x8xf32>, vector<8x8xf32> -> vector<8x8xf32>
    %cst_6 = arith.constant 0xFF800000 : f32
    %16 = vector.broadcast %cst_6 : f32 to vector<8x8xf32>
    %17 = arith.select %11, %15, %16 : vector<8x8xi1>, vector<8x8xf32>
    %cst_7 = arith.constant dense<0xFF800000> : vector<8xf32>
    %18 = vector.multi_reduction <maximumf>, %17, %cst_7 [1] : vector<8x8xf32> to vector<8xf32>
    %19 = vector.shape_cast %18 : vector<8xf32> to vector<8x1xf32>
    %20 = vector.broadcast %19 : vector<8x1xf32> to vector<8x8xf32>
    %21 = arith.subf %17, %20 : vector<8x8xf32>
    %22 = math.exp %21 : vector<8x8xf32>
    %cst_8 = arith.constant dense<0.000000e+00> : vector<8xf32>
    %23 = vector.multi_reduction <add>, %22, %cst_8 [1] : vector<8x8xf32> to vector<8xf32>
    %24 = vector.shape_cast %23 : vector<8xf32> to vector<8x1xf32>
    %cst_9 = arith.constant dense<0.000000e+00> : vector<8x8xf32>
    %25 = tpu.matmul %22, %14, %cst_9 {dimension_numbers = #tpu.dot_dimension_numbers<[1], [0], [0], [1], [0, 0, 1, 1], [], []>} : vector<8x8xf32>, vector<8x8xf32>, vector<8x8xf32> -> vector<8x8xf32>
    %26 = tpu.reciprocal %24 : vector<8x1xf32> -> vector<8x1xf32>
    %27 = vector.broadcast %26 : vector<8x1xf32> to vector<8x8xf32>
    %28 = arith.mulf %25, %27 : vector<8x8xf32>
    %29 = vector.extract_strided_slice %6 {offsets = [0, 8], sizes = [8, 8], strides = [1, 1]} : vector<8x32xf32> to vector<8x8xf32>
    %30 = vector.extract_strided_slice %7 {offsets = [0, 8], sizes = [8, 8], strides = [1, 1]} : vector<8x32xf32> to vector<8x8xf32>
    %31 = vector.extract_strided_slice %8 {offsets = [0, 8], sizes = [8, 8], strides = [1, 1]} : vector<8x32xf32> to vector<8x8xf32>
    %cst_10 = arith.constant dense<0.000000e+00> : vector<8x8xf32>
    %32 = tpu.matmul %29, %30, %cst_10 {dimension_numbers = #tpu.dot_dimension_numbers<[1], [1], [0], [0], [0, 0, 1, 0], [], []>} : vector<8x8xf32>, vector<8x8xf32>, vector<8x8xf32> -> vector<8x8xf32>
    %cst_11 = arith.constant 0xFF800000 : f32
    %33 = vector.broadcast %cst_11 : f32 to vector<8x8xf32>
    %34 = arith.select %11, %32, %33 : vector<8x8xi1>, vector<8x8xf32>
    %cst_12 = arith.constant dense<0xFF800000> : vector<8xf32>
    %35 = vector.multi_reduction <maximumf>, %34, %cst_12 [1] : vector<8x8xf32> to vector<8xf32>
    %36 = vector.shape_cast %35 : vector<8xf32> to vector<8x1xf32>
    %37 = vector.broadcast %36 : vector<8x1xf32> to vector<8x8xf32>
    %38 = arith.subf %34, %37 : vector<8x8xf32>
    %39 = math.exp %38 : vector<8x8xf32>
    %cst_13 = arith.constant dense<0.000000e+00> : vector<8xf32>
    %40 = vector.multi_reduction <add>, %39, %cst_13 [1] : vector<8x8xf32> to vector<8xf32>
    %41 = vector.shape_cast %40 : vector<8xf32> to vector<8x1xf32>
    %cst_14 = arith.constant dense<0.000000e+00> : vector<8x8xf32>
    %42 = tpu.matmul %39, %31, %cst_14 {dimension_numbers = #tpu.dot_dimension_numbers<[1], [0], [0], [1], [0, 0, 1, 1], [], []>} : vector<8x8xf32>, vector<8x8xf32>, vector<8x8xf32> -> vector<8x8xf32>
    %43 = tpu.reciprocal %41 : vector<8x1xf32> -> vector<8x1xf32>
    %44 = vector.broadcast %43 : vector<8x1xf32> to vector<8x8xf32>
    %45 = arith.mulf %42, %44 : vector<8x8xf32>
    %46 = vector.extract_strided_slice %6 {offsets = [0, 16], sizes = [8, 8], strides = [1, 1]} : vector<8x32xf32> to vector<8x8xf32>
    %47 = vector.extract_strided_slice %7 {offsets = [0, 16], sizes = [8, 8], strides = [1, 1]} : vector<8x32xf32> to vector<8x8xf32>
    %48 = vector.extract_strided_slice %8 {offsets = [0, 16], sizes = [8, 8], strides = [1, 1]} : vector<8x32xf32> to vector<8x8xf32>
    %cst_15 = arith.constant dense<0.000000e+00> : vector<8x8xf32>
    %49 = tpu.matmul %46, %47, %cst_15 {dimension_numbers = #tpu.dot_dimension_numbers<[1], [1], [0], [0], [0, 0, 1, 0], [], []>} : vector<8x8xf32>, vector<8x8xf32>, vector<8x8xf32> -> vector<8x8xf32>
    %cst_16 = arith.constant 0xFF800000 : f32
    %50 = vector.broadcast %cst_16 : f32 to vector<8x8xf32>
    %51 = arith.select %11, %49, %50 : vector<8x8xi1>, vector<8x8xf32>
    %cst_17 = arith.constant dense<0xFF800000> : vector<8xf32>
    %52 = vector.multi_reduction <maximumf>, %51, %cst_17 [1] : vector<8x8xf32> to vector<8xf32>
    %53 = vector.shape_cast %52 : vector<8xf32> to vector<8x1xf32>
    %54 = vector.broadcast %53 : vector<8x1xf32> to vector<8x8xf32>
    %55 = arith.subf %51, %54 : vector<8x8xf32>
    %56 = math.exp %55 : vector<8x8xf32>
    %cst_18 = arith.constant dense<0.000000e+00> : vector<8xf32>
    %57 = vector.multi_reduction <add>, %56, %cst_18 [1] : vector<8x8xf32> to vector<8xf32>
    %58 = vector.shape_cast %57 : vector<8xf32> to vector<8x1xf32>
    %cst_19 = arith.constant dense<0.000000e+00> : vector<8x8xf32>
    %59 = tpu.matmul %56, %48, %cst_19 {dimension_numbers = #tpu.dot_dimension_numbers<[1], [0], [0], [1], [0, 0, 1, 1], [], []>} : vector<8x8xf32>, vector<8x8xf32>, vector<8x8xf32> -> vector<8x8xf32>
    %60 = tpu.reciprocal %58 : vector<8x1xf32> -> vector<8x1xf32>
    %61 = vector.broadcast %60 : vector<8x1xf32> to vector<8x8xf32>
    %62 = arith.mulf %59, %61 : vector<8x8xf32>
    %63 = vector.extract_strided_slice %6 {offsets = [0, 24], sizes = [8, 8], strides = [1, 1]} : vector<8x32xf32> to vector<8x8xf32>
    %64 = vector.extract_strided_slice %7 {offsets = [0, 24], sizes = [8, 8], strides = [1, 1]} : vector<8x32xf32> to vector<8x8xf32>
    %65 = vector.extract_strided_slice %8 {offsets = [0, 24], sizes = [8, 8], strides = [1, 1]} : vector<8x32xf32> to vector<8x8xf32>
    %cst_20 = arith.constant dense<0.000000e+00> : vector<8x8xf32>
    %66 = tpu.matmul %63, %64, %cst_20 {dimension_numbers = #tpu.dot_dimension_numbers<[1], [1], [0], [0], [0, 0, 1, 0], [], []>} : vector<8x8xf32>, vector<8x8xf32>, vector<8x8xf32> -> vector<8x8xf32>
    %cst_21 = arith.constant 0xFF800000 : f32
    %67 = vector.broadcast %cst_21 : f32 to vector<8x8xf32>
    %68 = arith.select %11, %66, %67 : vector<8x8xi1>, vector<8x8xf32>
    %cst_22 = arith.constant dense<0xFF800000> : vector<8xf32>
    %69 = vector.multi_reduction <maximumf>, %68, %cst_22 [1] : vector<8x8xf32> to vector<8xf32>
    %70 = vector.shape_cast %69 : vector<8xf32> to vector<8x1xf32>
    %71 = vector.broadcast %70 : vector<8x1xf32> to vector<8x8xf32>
    %72 = arith.subf %68, %71 : vector<8x8xf32>
    %73 = math.exp %72 : vector<8x8xf32>
    %cst_23 = arith.constant dense<0.000000e+00> : vector<8xf32>
    %74 = vector.multi_reduction <add>, %73, %cst_23 [1] : vector<8x8xf32> to vector<8xf32>
    %75 = vector.shape_cast %74 : vector<8xf32> to vector<8x1xf32>
    %cst_24 = arith.constant dense<0.000000e+00> : vector<8x8xf32>
    %76 = tpu.matmul %73, %65, %cst_24 {dimension_numbers = #tpu.dot_dimension_numbers<[1], [0], [0], [1], [0, 0, 1, 1], [], []>} : vector<8x8xf32>, vector<8x8xf32>, vector<8x8xf32> -> vector<8x8xf32>
    %77 = tpu.reciprocal %75 : vector<8x1xf32> -> vector<8x1xf32>
    %78 = vector.broadcast %77 : vector<8x1xf32> to vector<8x8xf32>
    %79 = arith.mulf %76, %78 : vector<8x8xf32>
    %80 = tpu.concatenate %28, %45, %62, %79 in 1 : vector<8x8xf32>, vector<8x8xf32>, vector<8x8xf32>, vector<8x8xf32> -> vector<8x32xf32>
    %c0_25 = arith.constant 0 : index
    %c0_26 = arith.constant 0 : index
    %81 = vector.load %arg3[%c0_25, %c0_26] : memref<32x32xf32, #tpu.memory_space<vmem>>, vector<32x32xf32>
    %cst_27 = arith.constant dense<0.000000e+00> : vector<8x32xf32>
    %82 = tpu.matmul %80, %81, %cst_27 {dimension_numbers = #tpu.dot_dimension_numbers<[1], [0], [0], [1], [0, 0, 1, 1], [], []>} : vector<8x32xf32>, vector<32x32xf32>, vector<8x32xf32> -> vector<8x32xf32>
    %c0_28 = arith.constant 0 : index
    %c0_29 = arith.constant 0 : index
    %83 = vector.load %arg4[%c0_28, %c0_29] : memref<1x32xf32, #tpu.memory_space<vmem>>, vector<1x32xf32>
    %84 = vector.broadcast %83 : vector<1x32xf32> to vector<8x32xf32>
    %85 = arith.addf %82, %84 : vector<8x32xf32>
    %c0_30 = arith.constant 0 : index
    %c0_31 = arith.constant 0 : index
    %c0_32 = arith.constant 0 : index
    %86 = vector.load %arg5[%c0_30, %c0_31, %c0_32] : memref<1x8x32xf32, #tpu.memory_space<vmem>>, vector<1x8x32xf32>
    %87 = vector.shape_cast %86 : vector<1x8x32xf32> to vector<8x32xf32>
    %88 = vector.shape_cast %85 : vector<8x32xf32> to vector<1x8x32xf32>
    tpu.vector_store %arg5[%c0_30, %c0_31, %c0_32], %88 {strides = array<i32>} : memref<1x8x32xf32, #tpu.memory_space<vmem>>, vector<1x8x32xf32>,
    return
  }
  func.func @transform_0(%arg0: i32) -> (i32, i32, i32) {
    %c0_i32 = arith.constant 0 : i32
    %c0_i32_0 = arith.constant 0 : i32
    %c0_i32_1 = arith.constant 0 : i32
    return %arg0, %c0_i32, %c0_i32_0 : i32, i32, i32
  }
  func.func @transform_1(%arg0: i32) -> (i32, i32) {
    %c0_i32 = arith.constant 0 : i32
    %c0_i32_0 = arith.constant 0 : i32
    %c0_i32_1 = arith.constant 0 : i32
    return %c0_i32, %c0_i32_0 : i32, i32
  }
  func.func @transform_2(%arg0: i32) -> (i32, i32) {
    %c0_i32 = arith.constant 0 : i32
    %c0_i32_0 = arith.constant 0 : i32
    %c0_i32_1 = arith.constant 0 : i32
    return %c0_i32, %c0_i32_0 : i32, i32
  }
  func.func @transform_3(%arg0: i32) -> (i32, i32) {
    %c0_i32 = arith.constant 0 : i32
    %c0_i32_0 = arith.constant 0 : i32
    %c0_i32_1 = arith.constant 0 : i32
    return %c0_i32, %c0_i32_0 : i32, i32
  }
  func.func @transform_4(%arg0: i32) -> (i32, i32, i32) {
    %c0_i32 = arith.constant 0 : i32
    %c0_i32_0 = arith.constant 0 : i32
    %c0_i32_1 = arith.constant 0 : i32
    return %arg0, %c0_i32, %c0_i32_0 : i32, i32, i32
  }
}

</mosaic_0001>

<bundles_post_ra>
// kernel: tpu_custom_call.1
= control target key start
LH: loop header
LB: loop body
LE: loop exit
PB: predicated region body
PF: predicated region fallthrough
CT: control target
= control target key end

     0   :  { %9 = vsyncpa [#allocation3], 0  ;;  %s1946_s0 = inlined_call_operand.hbm [shape: f32[2,8,32], index: 0, kind: input, shape index: {}]   ;;  %s1947_s1 = inlined_call_operand.hbm [shape: f32[32,96], index: 1, kind: input, shape index: {}]   ;;  %s1948_s2 = inlined_call_operand.hbm [shape: f32[32,32], index: 2, kind: input, shape index: {}]   ;;  %s1949_s3 = inlined_call_operand.vmem [shape: f32[1,32], index: 3, kind: input, shape index: {}]   ;;  %s1950_s4 = inlined_call_operand.hbm [shape: f32[2,8,32], index: 4, kind: output, shape index: {}]  }
   0x1   :  { %11 = vsyncpa [#allocation3 + $0x1], 0 }
   0x2   :  { %12 = vsyncpa [#allocation6], 0 }
   0x3   :  { %13 = vsyncpa [#allocation4], 0 }
   0x4   :  { %15 = vsyncpa [#allocation4 + $0x1], 0  ;;  %s1636_s15 = smov 0   ;;  %s1638_s16 = smov 0  }
   0x5   :  { %s1640_s17 = smov 0   ;;  %s1642_s18 = smov 0  }
   0x6 LB: > { %s1657_s19 = sadd.s32 4294967295, %s1586_s18   ;;  %s1197_s20 = sadd.s32 4294967294, %s1586_s18   ;;  %s1586_s18 = sphi %s1642_s18, %s1970_s18   ;;  %s1582_s17 = sphi %s1640_s17, %s1969_s17   ;;  %s1578_s16 = sphi %s1638_s16, %s1968_s16   ;;  %s1574_s15 = sphi %s1636_s15, %s1967_s15  }
   0x7   : > { %p41_p0 = scmp.ne.s32.totalorder %s1578_s16, %s1574_s15  ;;  %p1951_p1 = scmp.eq.s32.totalorder %s1657_s19, 0 }
   0x8   : > { %p134_p3 = scmp.eq.s32.totalorder %s1197_s20, 1  ;;  %p1198_p5 = scmp.ge.s32.totalorder %s1586_s18, 1 }
   0x9   : > { %p1666_p4 = por %p1951_p1, %p41_p0  ;;  %p141_p7 = scmp.lt.s32.totalorder %s1586_s18, 3 }
   0xa   : > { %p1671_p6 = por %p134_p3, %p41_p0  ;;  %s1588_s24 = smov [#allocation5]  }
   0xb   : > { %s1954_s21 = scalar_select %p1666_p4, 1, 0 }
   0xc   : > { %s1955_s22 = scalar_select %p1671_p6, 1, 0 }
   0xd   : > { %p1676_p8 = pnand %p1198_p5, %p141_p7  ;;  %s153_s25 = sshll.u32 %s1588_s24, 4  ;;  %s1680_s25 = int_to_ptr.vmem [resolvable:$true] %s153_s25 }
   0xe   : > { %s1589_s27 = smov [#allocation7]   ;;  %s1430_s5 = scalar_lea.hbm %s1947_s1, 512 }
   0xf   : > { %p1340_p9 = pneg %p1676_p8  ;;  %s166_s28 = sshll.u32 %s1589_s27, 4  ;;  %s1691_s28 = int_to_ptr.vmem [resolvable:$true] %s166_s28 }
  0x10   : > { %p1431_p12 = scmp.ne.s32.totalorder %s1947_s1, %s1430_s5  ;;  %p1437_p5 = scmp.lt.u32.totalorder %s1430_s5, %s1947_s1 }
  0x11   : > { %p1687_p11 = pnand %p1340_p9, %p1951_p1 }
  0x13   : > { %p1432_p13 = pneg %p1687_p11 }
  0x15   : > { %p1433_p0 = pnand %p1432_p13, %p1431_p12 }
  0x17   : > { %p1434_p3 = pneg %p1433_p0 }
  0x19   : > { %p1439_p7 = pnand %p1437_p5, %p1434_p3 }
  0x1b   : > { %1442 = shalt.err (!%p1439_p7)
}
  0x1c   : > { %s1443_s10 = scalar_lea.vmem %s1680_s25, 512  ;;  %p1451_p2 = scmp.lt.s32.totalorder %s1680_s25, %s1680_s25 }
  0x1d   : > { %p1444_p9 = scmp.ne.s32.totalorder %s1680_s25, %s1443_s10  ;;  %p1452_p12 = scmp.lt.s32.totalorder %s1443_s10, %s1443_s10 }
  0x1f   : > { %p1446_p10 = pnand %p1444_p9, %p1432_p13  ;;  %p1453_p0 = por %p1452_p12, %p1451_p2 }
  0x21   : > { %p1447_p1 = pneg %p1446_p10 }
  0x23   : > { %p1454_p6 = pnand %p1453_p0, %p1447_p1 }
  0x25   : > { %1457 = shalt.err (!%p1454_p6)
}
  0x26   : > { %s1590_s11 = smov 128   ;;  %s1591_s12 = smov 8  }
  0x27   : > { %1343 = dma.hbm_to_vmem [thread:$0]  (!%p1687_p11), %s1947_s1, 512, %s1680_s25, [#allocation6], %s1590_s11, %s1590_s11, %s1591_s12  }
  0x28   : > { %s1458_s27 = scalar_lea.hbm %s1948_s2, 512 }
  0x29   : > { %p1459_p2 = scmp.ne.s32.totalorder %s1948_s2, %s1458_s27  ;;  %p1465_p10 = scmp.lt.u32.totalorder %s1458_s27, %s1948_s2 }
  0x2b   : > { %p1461_p1 = pnand %p1459_p2, %p1432_p13 }
  0x2d   : > { %p1462_p6 = pneg %p1461_p1 }
  0x2f   : > { %p1467_p3 = pnand %p1465_p10, %p1462_p6 }
  0x31   : > { %1470 = shalt.err (!%p1467_p3)
}
  0x32   : > { %s1471_s25 = scalar_lea.vmem %s1691_s28, 512  ;;  %p1479_p12 = scmp.lt.s32.totalorder %s1691_s28, %s1691_s28 }
  0x33   : > { %p1472_p5 = scmp.ne.s32.totalorder %s1691_s28, %s1471_s25  ;;  %p1480_p0 = scmp.lt.s32.totalorder %s1471_s25, %s1471_s25 }
  0x35   : > { %p1474_p7 = pnand %p1472_p5, %p1432_p13  ;;  %p1481_p2 = por %p1480_p0, %p1479_p12 }
  0x37   : > { %p1475_p9 = pneg %p1474_p7 }
  0x39   : > { %p1482_p1 = pnand %p1481_p2, %p1475_p9 }
  0x3b   : > { %1485 = shalt.err (!%p1482_p1)
}
  0x3c   : > { %1346 = dma.hbm_to_vmem [thread:$0]  (!%p1687_p11), %s1948_s2, 512, %s1691_s28, [#allocation6], %s1590_s11, %s1590_s11, %s1591_s12  }
  0x3d   : > { %s1746_s9 = sadd.s32 1, %s1586_s18   ;;  %s28_s26 = sadd.s32 1, %s1582_s17 }
  0x3e   : > { %s25_s10 = ssub.s32 %s1586_s18, %s1746_s9  ;;  %p35_p13 = scmp.ne.s32.totalorder %s1582_s17, %s1578_s16 }
  0x3f   : > { %p26_p6 = scmp.eq.s32.totalorder %s25_s10, 0  ;;  %p36_p10 = scmp.eq.s32.totalorder %s1586_s18, 0 }
  0x40   : > { %p1958_p3 = scmp.eq.s32.totalorder %s1657_s19, 1  ;;  %p1357_p7 = scmp.lt.s32.totalorder %s1586_s18, 2 }
  0x41   : > { %s1762_s14 = scalar_select %p26_p6, %s1582_s17, %s28_s26  }
  0x42   : > { %p1756_p5 = por %p1958_p3, %p35_p13  ;;  %p37_p9 = por %p36_p10, %p35_p13 }
  0x43   : > { %s183_s20 = sand.u32 1, %s1582_s17   ;;  %s1203_s28 = sshll.u32 %s1586_s18, 7 }
  0x44   : > { %s1959_s13 = scalar_select %p1756_p5, 1, 0 }
  0x45   : > { %s1202_s24 = sshll.u32 %s183_s20, 3  ;;  %s1769_s27 = scalar_lea.hbm %s1946_s0, %s1203_s28 }
  0x46   : > { %s187_s29 = scalar_lea.vmem [#allocation2], %s1202_s24  ;;  %p1773_p11 = pnand %p1357_p7, %p37_p9 }
  0x47   : > { %s194_s30 = sshll.u32 %s187_s29, 4  ;;  %s184_s6 = scalar_lea.sflag [#allocation3], %s183_s20  ;;  %s1771_s30 = int_to_ptr.vmem [resolvable:$true] %s194_s30 }
  0x48   : > { %s1486_s25 = scalar_lea.hbm %s1769_s27, 128  ;;  %p1488_p0 = pneg %p1773_p11 }
  0x49   : > { %p1487_p12 = scmp.ne.s32.totalorder %s1769_s27, %s1486_s25  ;;  %s1491_s26 = scalar_lea.hbm %s1946_s0, 256 }
  0x4a   : > { %p1492_p13 = scmp.lt.u32.totalorder %s1769_s27, %s1946_s0  ;;  %p1493_p6 = scmp.lt.u32.totalorder %s1491_s26, %s1486_s25 }
  0x4b   : > { %p1489_p2 = pnand %p1488_p0, %p1487_p12  ;;  %p1495_p3 = scmp.lt.u32.totalorder %s1486_s25, %s1769_s27 }
  0x4c   : > { %p1494_p10 = por %p1493_p6, %p1492_p13 }
  0x4d   : > { %p1490_p1 = pneg %p1489_p2 }
  0x4e   : > { %p1496_p7 = por %p1495_p3, %p1494_p10 }
  0x50   : > { %p1497_p9 = pnand %p1496_p7, %p1490_p1 }
  0x52   : > { %1500 = shalt.err (!%p1497_p9)
}
  0x53   : > { %s1501_s20 = scalar_lea.vmem %s1771_s30, 128  ;;  %s1592_s28 = smov [#allocation2]  }
  0x54   : > { %p1502_p12 = scmp.ne.s32.totalorder %s1771_s30, %s1501_s20  ;;  %s1506_s11 = sshll.u32 %s1592_s28, 4  ;;  %s1507_s11 = int_to_ptr.vmem [resolvable:$false] %s1506_s11 }
  0x55   : > { %s1508_s12 = scalar_lea.vmem %s1507_s11, 256  ;;  %p1509_p4 = scmp.lt.s32.totalorder %s1771_s30, %s1507_s11 }
  0x56   : > { %p1504_p2 = pnand %p1502_p12, %p1488_p0  ;;  %p1510_p13 = scmp.lt.s32.totalorder %s1508_s12, %s1501_s20 }
  0x58   : > { %p1505_p5 = pneg %p1504_p2  ;;  %p1511_p6 = por %p1510_p13, %p1509_p4 }
  0x5a   : > { %p1512_p10 = pnand %p1511_p6, %p1505_p5 }
  0x5c   : > { %1515 = shalt.err (!%p1512_p10)
}
  0x5d   : > { %1350 = dma.hbm_to_vmem [thread:$0]  (!%p1773_p11), %s1769_s27, 128, %s1771_s30, %s184_s6  }
  0x5e   : > { %203 = sbr.rel (%p1676_p8) target bundleno = 1757 (0x6dd), region = 36  ;;  %s1805_s29 = sand.u32 (!%p1676_p8), 1, %s1578_s16  }
  0x5f   : > { %s1205_s25 = sshll.u32 (!%p1676_p8), %s1805_s29, 3  ;;  %s206_s7 = scalar_lea.sflag (!%p1676_p8), [#allocation3], %s1805_s29 }
  0x60   : > { %s209_s8 = scalar_lea.vmem (!%p1676_p8), [#allocation2], %s1205_s25  ;;  %p1961_p4 = scmp.ne.s32.totalorder (!%p1676_p8), %s1954_s21, 0 }
  0x65   : > { %1561 = dma.done.wait (%p1961_p4), %s206_s7, 128  }
  0x66   : > { %1563 = vsyncadd (%p1961_p4), %s206_s7, 4294967168  ;;  %p1962_p5 = scmp.eq.s32.totalorder %s1657_s19, 0 }
  0x68   : > { %1565 = dma.done.wait (%p1962_p5), [#allocation6], 1024   ;;  %p1963_p8 = pmov %p1962_p5 }
  0x69   : > { %v1593_v0 = vmov 0.0|0.0   ;;  %vm1594_vm0 = vmmov 0   ;;  %v1595_v1 = vmov 0.0   ;;  %v243_v2 = vld [vmem:[#allocation5] sm:$0xff]  ;;  %v244_v3 = vld [vmem:[#allocation5 + $0x8] sm:$0xff]  ;;  %v245_v4 = vld [vmem:[#allocation5 + $0x10] sm:$0xff]  ;;  %v322_v20 = vlaneseq }
  0x6a   : > { %1567 = vsyncadd (%p1963_p8), [#allocation6], 4294966272  ;;  %1316 = vmatprep.subr.bf16.mxu0 %v1593_v0  ;;  %1262 = vmatprep.mubr.msk.f32.mxu0 %vm1594_vm0, %v1595_v1  ;;  %v1317_v5 = vpack.c.bf16 %v244_v3, %v243_v2  ;;  %v246_v6 = vld [vmem:[#allocation5 + $0x18] sm:$0xff]  ;;  %vm247_vm1 = vcmask 261120   ;;  %s1596_s21 = smov 64   ;;  %s1597_s23 = smov 96  }
  0x6b   : > { %1265 = vmatprep.subr.mxu1 %v1595_v1  ;;  %1267 = vmatprep.mubr.msk.f32.mxu1 %vm1594_vm0, %v1595_v1  ;;  %v1320_v7 = vpack.c.bf16 %v246_v6, %v245_v4  ;;  %v242_v8 = vld [vmem:[%s209_s8] sm:$0xff]  ;;  %s1598_s27 = smov 88   ;;  %s1599_s30 = smov 120   ;;  %vm330_vm2 = vcmask 64512   ;;  %v323_v21 = vshrl.u32 %v322_v20, 7  ;;  %v325_v22 = vand.u32 127, %v322_v20 }
  0x6c   : > { %1318 = vmatpush3.bf16.msra.mxu0 %v1317_v5  ;;  %s1600_s5 = smov 80   ;;  %s1601_s6 = smov 112   ;;  %v1009_v3 = vld [vmem:[#allocation7] sm:$0xff]  ;;  %v1010_v4 = vld [vmem:[#allocation7 + $0x8] sm:$0xff]  ;;  %vm1005_vm4 = vcmask 130048   ;;  %vm1007_vm5 = vcmask 195584  }
  0x6d   : > { %1319 = vmatprep.subr.bf16.mxu0 %v1593_v0  ;;  %s1602_s26 = smov 72   ;;  %s1603_s10 = smov 104   ;;  %vm326_vm3 = vcmp.le.s32.totalorder %v325_v22, %v323_v21  ;;  %v1323_v6 = vpack.c.bf16 %v1010_v4, %v1009_v3 }
  0x6e   : > { %s1604_s24 = smov 56   ;;  %s1605_s20 = smov 40  }
  0x6f   : > { %s1606_s28 = smov 48   ;;  %s1607_s11 = smov 8  }
  0x70   : > { %1321 = vmatpush3.bf16.msra.mxu0 %v1320_v7  ;;  %v1011_v7 = vld [vmem:[#allocation7 + $0x10] sm:$0xff]  ;;  %s1608_s12 = smov 16   ;;  %s1609_s7 = smov 24  }
  0x71   : > { %1285 = vmatprep.subr.mxu0 %v1595_v1  ;;  %p1964_p0 = scmp.ne.s32.totalorder %s1959_s13, 0 }
  0x73   : > { %1263 = vmatmul.mubr.msk.f32.vlgmr.msra.gmra.mrb[0].mxu0 %vm247_vm1, %v242_v8  ;;  %v1012_v8 = vld [vmem:[#allocation7 + $0x18] sm:$0xff] }
  0x74   : > { %1287 = vmatprep.mubr.msk.f32.mxu0 %vm1594_vm0, %v1595_v1 }
 0x146   : > { %v1830_v9 = vpop.f32.mrb[0].mxu0 }
 0x147   : > { %416 = vrot.lane.b32.xlu1 %v1830_v9, %s1596_s21  ;;  %328 = vrot.lane.b32.xlu0 %v1830_v9, %s1597_s23  ;;  %v1264_v10 = vpop.f32.mrb[1].mxu0  ;;  %v321_v11 = vmul.f32 0.17677669, %v1830_v9  ;;  %s1225_s23 = sshll.u32 %s1657_s19, 7 }
 0x148   : > { %v1326_v10 = vpack.c.bf16 %v1012_v8, %v1011_v7 }
 0x14b   : > { %496 = vrot.lane.b32.xlu1 %v1830_v9, %s1598_s27  ;;  %s241_s27 = scalar_lea.vmem [#allocation8], %s1205_s25  ;;  %s1610_s25 = smov [#allocation8]  }
 0x14f   : > { %494 = vrot.lane.b32.xlu1 %v321_v11, %s1599_s30  ;;  %s1108_s30 = sshll.u32 %s241_s27, 4  ;;  %s1903_s30 = int_to_ptr.vmem [resolvable:$true] %s1108_s30 }
 0x150   : > { %s1516_s19 = scalar_lea.vmem %s1903_s30, 128 }
 0x151   : > { %p1517_p11 = scmp.ne.s32.totalorder %s1903_s30, %s1516_s19 }
 0x153   : > { %662 = vrot.lane.b32.xlu1 %v1830_v9, %s1600_s5  ;;  %p1518_p1 = pnand %p1517_p11, %p1964_p0 }
 0x155   : > { %p1519_p3 = pneg %p1518_p1 }
 0x157   : > { %660 = vrot.lane.b32.xlu1 %v321_v11, %s1601_s6 }
 0x15b   : > { %828 = vrot.lane.b32.xlu1 %v1830_v9, %s1602_s26  ;;  %s1901_s26 = scalar_lea.hbm %s1950_s4, %s1225_s23 }
 0x15f   : > { %826 = vrot.lane.b32.xlu1 %v321_v11, %s1603_s10  ;;  %s1095_s10 = scalar_lea.sflag [#allocation4], %s1805_s29 }
 0x1b9   : > { %v417_v12 = vpop.permute.xlu1 %416  ;;  %v329_v13 = vpop.permute.xlu0 %328 }
 0x1ba   : > { %1266 = vmatpush3.xpose.msk.msra.mxu1 %vm330_vm2, %v329_v13 }
 0x1bb   : > { %1270 = vmatprep.subr.mxu1 %v1595_v1 }
 0x1bd   : > { %v497_v14 = vpop.permute.xlu1 %496  ;;  %1268 = vmatmul.mubr.msk.f32.vlgmr.msra.gmra.mrb[0].mxu1 %vm330_vm2, %v321_v11 }
 0x1be   : > { %1271 = vmatpush3.msra.mxu1 %v417_v12  ;;  %1272 = vmatprep.mubr.msk.f32.mxu1 %vm1594_vm0, %v1595_v1 }
 0x1bf   : > { %1275 = vmatprep.subr.mxu1 %v1595_v1 }
 0x1c1   : > { %v495_v15 = vpop.permute.xlu1 %494 }
 0x1c5   : > { %v663_v16 = vpop.permute.xlu1 %662 }
 0x1c6   : > { %1286 = vmatpush3.xpose.msk.msra.mxu0 %vm330_vm2, %v663_v16 }
 0x1c7   : > { %1295 = vmatprep.subr.mxu0 %v1595_v1 }
 0x1c9   : > { %v661_v17 = vpop.permute.xlu1 %660 }
 0x1ca   : > { %1288 = vmatmul.mubr.msk.f32.vlgmr.msra.gmra.mrb[2].mxu0 %vm330_vm2, %v661_v17 }
 0x1cb   : > { %1297 = vmatprep.mubr.msk.f32.mxu0 %vm1594_vm0, %v1595_v1 }
 0x1cd   : > { %v829_v18 = vpop.permute.xlu1 %828 }
 0x1ce   : > { %1296 = vmatpush3.xpose.msk.msra.mxu0 %vm330_vm2, %v829_v18 }
 0x1cf   : > { %1322 = vmatprep.subr.bf16.mxu0 %v1593_v0 }
 0x1d1   : > { %v827_v19 = vpop.permute.xlu1 %826 }
 0x1d2   : > { %1298 = vmatmul.mubr.msk.f32.vlgmr.msra.gmra.mrb[4].mxu0 %vm330_vm2, %v827_v19 }
 0x1d3   : > { %1313 = vmatprep.mubr.msk.f32.mxu0 %vm1594_vm0, %v1595_v1  ;;  %1324 = vmatpush3.bf16.msra.mxu0 %v1323_v6 }
 0x1d4   : > { %1325 = vmatprep.subr.bf16.mxu0 %v1593_v0 }
 0x1d7   : > { %1327 = vmatpush3.bf16.msra.mxu0 %v1326_v10 }
 0x290   : > { %v402_v23 = vpop.f32.mrb[0].mxu1 }
 0x291   : > { %v406_v24 = vsel %vm326_vm3, %v402_v23, -inf  ;;  %v1269_v25 = vpop.f32.mrb[1].mxu1 }
 0x292   : > { %v407_v26 = vsel %vm330_vm2, %v406_v24, -inf }
 0x293   : > { %408 = vmax.xlane.f32.xlu0 %v407_v26 }
 0x29d   : > { %v734_v27 = vpop.f32.mrb[2].mxu0 }
 0x29e   : > { %v1289_v28 = vpop.f32.mrb[3].mxu0  ;;  %v738_v31 = vsel %vm326_vm3, %v734_v27, -inf }
 0x29f   : > { %v739_v32 = vsel %vm330_vm2, %v738_v31, -inf }
 0x2a5   : > { %v900_v29 = vpop.f32.mrb[4].mxu0 }
 0x2a6   : > { %v1299_v30 = vpop.f32.mrb[5].mxu0  ;;  %v904_v33 = vsel %vm326_vm3, %v900_v29, -inf }
 0x2a7   : > { %v905_v34 = vsel %vm330_vm2, %v904_v33, -inf  ;;  %v1222_v30 = vld [vmem:[%s1949_s3] ss:$0 sm:$0xff] }
 0x2a9   : > { %582 = vrot.lane.b32.xlu0 %v1830_v9, %s1604_s24  ;;  %s1520_s24 = sshll.u32 %s1610_s25, 4  ;;  %s1521_s24 = int_to_ptr.vmem [resolvable:$false] %s1520_s24 }
 0x2aa   : > { %p1523_p7 = scmp.lt.s32.totalorder %s1903_s30, %s1521_s24 }
 0x2c8   : > { %740 = vmax.xlane.f32.xlu0 %v739_v32 }
 0x2cc   : > { %906 = vmax.xlane.f32.xlu0 %v905_v34 }
 0x2e2   : > { %914 = vrot.lane.b32.xlu0 %v1830_v9, %s1605_s20  ;;  %s1522_s20 = scalar_lea.vmem %s1521_s24, 256 }
 0x2e3   : > { %p1524_p9 = scmp.lt.s32.totalorder %s1522_s20, %s1516_s19 }
 0x2e5   : > { %p1525_p12 = por %p1524_p9, %p1523_p7 }
 0x2e7   : > { %p1526_p2 = pnand %p1525_p12, %p1519_p3 }
 0x320   : > { %v409_v35 = vpop.xlane.xlu0 %408 }
 0x321   : > { %v410_v36 = vsub.f32 %v406_v24, %v409_v35 }
 0x323   : > { %v411_v37 = vmul.f32 1.442695, %v410_v36 }
 0x324   : > { %v583_v39 = vpop.permute.xlu0 %582 }
 0x325   : > { %1414 = vpow2.f32 %v411_v37 }
 0x32f   : > { %v1415_v38 = vpop.eup %1414 }
 0x330   : > { %1273 = vmatmul.mubr.msk.f32.vlgmr.msra.gmra.mrb[2].mxu1 %vm330_vm2, %v1415_v38  ;;  %v413_v63 = vsel %vm330_vm2, %v1415_v38, 0.0 }
 0x331   : > { %1276 = vmatpush3.xpose.msk.msra.mxu1 %vm330_vm2, %v497_v14  ;;  %1277 = vmatprep.mubr.msk.f32.mxu1 %vm1594_vm0, %v1595_v1 }
 0x332   : > { %1280 = vmatprep.subr.mxu1 %v1595_v1 }
 0x334   : > { %1278 = vmatmul.mubr.msk.f32.vlgmr.msra.gmra.mrb[4].mxu1 %vm330_vm2, %v495_v15 }
 0x335   : > { %1281 = vmatpush3.msra.mxu1 %v583_v39  ;;  %1282 = vmatprep.mubr.msk.f32.mxu1 %vm1594_vm0, %v1595_v1 }
 0x336   : > { %1290 = vmatprep.subr.mxu1 %v1595_v1 }
 0x355   : > { %v741_v46 = vpop.xlane.xlu0 %740 }
 0x356   : > { %v742_v47 = vsub.f32 %v738_v31, %v741_v46 }
 0x358   : > { %v743_v48 = vmul.f32 1.442695, %v742_v47 }
 0x359   : > { %v907_v51 = vpop.xlane.xlu0 %906 }
 0x35a   : > { %1416 = vpow2.f32 %v743_v48  ;;  %v908_v52 = vsub.f32 %v904_v33, %v907_v51 }
 0x35c   : > { %v909_v55 = vmul.f32 1.442695, %v908_v52 }
 0x35d   : > { %v915_v61 = vpop.permute.xlu0 %914 }
 0x364   : > { %v1417_v49 = vpop.eup %1416 }
 0x365   : > { %v745_v50 = vsel %vm330_vm2, %v1417_v49, 0.0 }
 0x403   : > { %v1871_v40 = vpop.f32.mrb[2].mxu1 }
 0x404   : > { %v1274_v41 = vpop.f32.mrb[3].mxu1 }
 0x407   : > { %v568_v42 = vpop.f32.mrb[4].mxu1 }
 0x408   : > { %v572_v43 = vsel %vm326_vm3, %v568_v42, -inf  ;;  %v1279_v44 = vpop.f32.mrb[5].mxu1 }
 0x409   : > { %v573_v45 = vsel %vm330_vm2, %v572_v43, -inf }
 0x40a   : > { %574 = vmax.xlane.f32.xlu1 %v573_v45 }
 0x41b   : > { %748 = vrot.lane.b32.xlu1 %v1830_v9, %s1606_s28 }
 0x43f   : > { %746 = vadd.xlane.f32.xlu1 %v745_v50 }
 0x497   : > { %v575_v53 = vpop.xlane.xlu1 %574 }
 0x498   : > { %v576_v54 = vsub.f32 %v572_v43, %v575_v53 }
 0x49a   : > { %v577_v56 = vmul.f32 1.442695, %v576_v54 }
 0x49b   : > { %v749_v58 = vpop.permute.xlu1 %748 }
 0x49c   : > { %1418 = vpow2.f32 %v577_v56 }
 0x49d   : > { %1420 = vpow2.f32 %v909_v55 }
 0x4a6   : > { %v1419_v57 = vpop.eup %1418 }
 0x4a7   : > { %1283 = vmatmul.mubr.msk.f32.vlgmr.msra.gmra.mrb[6].mxu1 %vm330_vm2, %v1419_v57  ;;  %v579_v59 = vsel %vm330_vm2, %v1419_v57, 0.0  ;;  %v1421_v60 = vpop.eup %1420 }
 0x4a8   : > { %1291 = vmatpush3.msra.mxu1 %v749_v58  ;;  %580 = vadd.xlane.f32.xlu0 %v579_v59  ;;  %v911_v62 = vsel %vm330_vm2, %v1421_v60, 0.0 }
 0x4a9   : > { %1292 = vmatprep.mubr.msk.f32.mxu1 %vm1594_vm0, %v1595_v1  ;;  %1300 = vmatprep.subr.mxu1 %v1595_v1 }
 0x4ab   : > { %1293 = vmatmul.mubr.msk.f32.vlgmr.msra.gmra.mrb[8].mxu1 %vm330_vm2, %v1417_v49 }
 0x4ac   : > { %1301 = vmatpush3.msra.mxu1 %v915_v61  ;;  %912 = vadd.xlane.f32.xlu0 %v911_v62 }
 0x4ad   : > { %1302 = vmatprep.mubr.msk.f32.mxu1 %vm1594_vm0, %v1595_v1 }
 0x4af   : > { %1303 = vmatmul.mubr.msk.f32.vlgmr.msra.gmra.mrb[10].mxu1 %vm330_vm2, %v1421_v60 }
 0x4b0   : > { %414 = vadd.xlane.f32.xlu0 %v413_v63 }
 0x4cc   : > { %v747_v5 = vpop.xlane.xlu1 %746 }
 0x535   : > { %v581_v2 = vpop.xlane.xlu0 %580 }
 0x536   : > { %1422 = vrcp.f32 %v581_v2 }
 0x537   : > { %1424 = vrcp.f32 %v747_v5 }
 0x539   : > { %v913_v9 = vpop.xlane.xlu0 %912 }
 0x53a   : > { %1426 = vrcp.f32 %v913_v9 }
 0x53d   : > { %v415_v21 = vpop.xlane.xlu0 %414 }
 0x53e   : > { %1428 = vrcp.f32 %v415_v21 }
 0x540   : > { %v1423_v1 = vpop.eup %1422 }
 0x541   : > { %v1425_v14 = vpop.eup %1424 }
 0x544   : > { %v1427_v18 = vpop.eup %1426 }
 0x548   : > { %v1429_v22 = vpop.eup %1428 }
 0x549   : > { %v493_v24 = vmul.f32 %v1429_v22, %v1871_v40 }
 0x57a   : > { %v654_v11 = vpop.f32.mrb[6].mxu1 }
 0x57b   : > { %v659_v12 = vmul.f32 %v1423_v1, %v654_v11  ;;  %v1284_v13 = vpop.f32.mrb[7].mxu1 }
 0x57d   : > { %993 = vrot.lane.b32.xlu0 %v659_v12, %s1607_s11 }
 0x57e   : > { %v820_v15 = vpop.f32.mrb[8].mxu1 }
 0x57f   : > { %v825_v16 = vmul.f32 %v1425_v14, %v820_v15  ;;  %v1294_v17 = vpop.f32.mrb[9].mxu1 }
 0x581   : > { %997 = vrot.lane.b32.xlu1 %v825_v16, %s1608_s12 }
 0x582   : > { %v986_v0 = vpop.f32.mrb[10].mxu1 }
 0x583   : > { %v991_v19 = vmul.f32 %v1427_v18, %v986_v0  ;;  %v1304_v20 = vpop.f32.mrb[11].mxu1 }
 0x585   : > { %1001 = vrot.lane.b32.xlu0 %v991_v19, %s1609_s7 }
 0x5ef   : > { %v994_v23 = vpop.permute.xlu0 %993 }
 0x5f0   : > { %v1004_v26 = vsel %vm330_vm2, %v493_v24, %v994_v23 }
 0x5f3   : > { %v998_v25 = vpop.permute.xlu1 %997 }
 0x5f4   : > { %v1006_v27 = vsel %vm1005_vm4, %v1004_v26, %v998_v25 }
 0x5f7   : > { %v1002_v28 = vpop.permute.xlu0 %1001 }
 0x5f8   : > { %v1008_v29 = vsel %vm1007_vm5, %v1006_v27, %v1002_v28 }
 0x5f9   : > { %1314 = vmatmul.mubr.msk.f32.vlgmr.msra.gmra.mrb[6].mxu0 %vm247_vm1, %v1008_v29 }
 0x6cc   : > { %v1089_v31 = vpop.f32.mrb[6].mxu0 }
 0x6cd   : > { %v1090_v32 = vadd.f32 %v1222_v30, %v1089_v31  ;;  %v1315_v33 = vpop.f32.mrb[7].mxu0 }
 0x6cf   : > { %1093 = vst.msk [vmem:[%s241_s27] sm:$0xff] %vm247_vm1, %v1090_v32 }
 0x6d0   : > { %1529 = shalt.err (!%p1526_p2)
}
 0x6d1   : > { %s1530_s29 = scalar_lea.hbm %s1901_s26, 128  ;;  %s1534_s12 = scalar_lea.hbm %s1950_s4, 256 }
 0x6d2   : > { %p1531_p13 = scmp.ne.s32.totalorder %s1901_s26, %s1530_s29  ;;  %p1535_p4 = scmp.lt.u32.totalorder %s1901_s26, %s1950_s4 }
 0x6d3   : > { %p1536_p5 = scmp.lt.u32.totalorder %s1534_s12, %s1530_s29  ;;  %p1538_p11 = scmp.lt.u32.totalorder %s1530_s29, %s1901_s26 }
 0x6d4   : > { %p1532_p6 = pnand %p1531_p13, %p1964_p0 }
 0x6d5   : > { %p1537_p8 = por %p1536_p5, %p1535_p4 }
 0x6d6   : > { %p1533_p10 = pneg %p1532_p6 }
 0x6d7   : > { %p1539_p1 = por %p1538_p11, %p1537_p8 }
 0x6d9   : > { %p1540_p3 = pnand %p1539_p1, %p1533_p10 }
 0x6db   : > { %1543 = shalt.err (!%p1540_p3)
}
 0x6dc   : > { %1338 = dma.vmem_to_hbm [thread:$0]  (%p1964_p0), %s1903_s30, 128, %s1901_s26, %s1095_s10  }
 0x6dd PF: > { %s1120_s21 = sand.u32 1, %s1574_s15   ;;  %p1965_p7 = scmp.ne.s32.totalorder %s1955_s22, 0 }
 0x6de   : > { %p1966_p9 = scmp.ge.s32.totalorder %s1586_s18, 2  ;;  %s1121_s23 = scalar_lea.sflag [#allocation4], %s1120_s21 }
 0x6e0   : > { %p1352_p12 = pnand %p1966_p9, %p1965_p7 }
 0x6e2   : > { %1569 = dma.done.wait (!%p1352_p12), %s1121_s23, 128  }
 0x6e3   : > { %1571 = vsyncadd (!%p1352_p12), %s1121_s23, 4294967168  ;;  %p18_p2 = scmp.ge.s32.totalorder %s1746_s9, 4   ;;  %s1967_s15 = smov %s1578_s16 }
 0x6e4   : > { %s1968_s16 = smov %s1582_s17  ;;  %s1969_s17 = smov %s1762_s14 }
 0x6e5   : > { %s1970_s18 = smov %s1746_s9  ;;  %20 = sbr.rel (!%p18_p2) target bundleno = 6 (0x6), region = 89 }
 0x6ec   :  { %1126 = vsyncpa [#allocation3], 1 }
 0x6ed   :  { %1128 = vsyncpa [#allocation3 + $0x1], 1 }
 0x6ee   :  { %1129 = vsyncpa [#allocation6], 1 }
 0x6ef   :  { %1130 = vsyncpa [#allocation4], 1 }
 0x6f0   :  { %1132 = vsyncpa [#allocation4 + $0x1], 1 }

</bundles_post_ra>
